<compile_context>
chip_gen: v5e
topology: v5e:2x2
jax: 0.10.0
libtpu: 0.0.40
codegen_flags: <defaults>
</compile_context>

<pallas_src>
import functools

import jax
import jax.numpy as jnp
from jax.experimental import pallas as pl
from jax.experimental.pallas import tpu as pltpu


def _mask_ce_kernel(logits_ref, picked_ref, out_ref, m_sc, l_sc,
                    *, n_rows, n_vocab, mask_vocab_tail):
    """One (row_tile, vocab_tile) step of online-logsumexp cross-entropy."""
    # program_id / num_programs must be bound at the kernel's top level
    # (not inside pl.when bodies) so the interpret path can substitute them.
    ri = pl.program_id(0)
    vj = pl.program_id(1)
    n_v = pl.num_programs(1)

    @pl.when(vj == 0)
    def _():
        m_sc[...] = jnp.full(m_sc.shape, -jnp.inf, jnp.float32)
        l_sc[...] = jnp.zeros(l_sc.shape, jnp.float32)

    logits = logits_ref[...].astype(jnp.float32)          # [tn, tv] cast in-kernel
    tn, tv = logits.shape

    if mask_vocab_tail:
        # V % tv != 0: neutralize out-of-range columns (edge-block garbage)
        # so they cannot poison valid rows' logsumexp.
        local_col = jax.lax.broadcasted_iota(jnp.int32, (tn, tv), 1)
        logits = jnp.where(local_col + vj * tv < n_vocab, logits, -1e30)

    # Online logsumexp across vocab tiles.
    m_prev = m_sc[...]
    m_new = jnp.maximum(m_prev, jnp.max(logits, axis=-1, keepdims=True))
    l_sc[...] = l_sc[...] * jnp.exp(m_prev - m_new) + jnp.sum(
        jnp.exp(logits - m_new), axis=-1, keepdims=True)
    m_sc[...] = m_new

    @pl.when(vj == n_v - 1)
    def _():
        row = ri * tn + jax.lax.broadcasted_iota(jnp.int32, (tn, 1), 0)
        ce = m_sc[...] + jnp.log(l_sc[...]) - picked_ref[...]   # [tn, 1]
        ce = jnp.where(row < n_rows, ce, 0.0)                   # drop tail rows (NaN-safe)
        out_ref[...] = jnp.sum(ce).reshape(1, 1, 1)


def _round_up(x, m):
    return ((x + m - 1) // m) * m


def mask_criterion(logits, target, mask, *, tile_n=256, tile_v=4096):
    """logits: [B, T, V]; target: [B, T+1] int; mask: [B, T+1] float."""
    B, T, V = logits.shape
    N = B * T

    logits2 = logits.reshape(N, V)                        # native dtype on the wire
    target2 = target[:, 1:].reshape(N, 1).astype(jnp.int32)
    mask2 = mask[:, 1:].astype(jnp.float32)

    # Target-logit gather hoisted out of the kernel (touches only N elements).
    picked = jnp.take_along_axis(logits2, target2, axis=-1).astype(jnp.float32)

    # Row tile: multiple of 8, capped so the parallel row axis spans >= 2 tiles
    # when N allows (keeps both v7x TensorCores busy).  No padding of logits.
    tn = min(tile_n, max(N // 2, 1))
    tn = _round_up(max(tn, 1), 8)
    grid_rows = pl.cdiv(N, tn)

    # Vocab tile: full V when small; otherwise a multiple of 128.
    if V <= tile_v:
        tv = V
    else:
        tv = _round_up(min(tile_v, V), 128)
    grid_v = pl.cdiv(V, tv)
    mask_vocab_tail = (V % tv) != 0

    grid = (grid_rows, grid_v)

    partials = pl.pallas_call(
        functools.partial(_mask_ce_kernel, n_rows=N, n_vocab=V,
                          mask_vocab_tail=mask_vocab_tail),
        out_shape=jax.ShapeDtypeStruct((grid_rows, 1, 1), jnp.float32),
        grid=grid,
        in_specs=[
            pl.BlockSpec((tn, tv), lambda i, j: (i, j)),
            pl.BlockSpec((tn, 1), lambda i, j: (i, 0)),
        ],
        out_specs=pl.BlockSpec((1, 1, 1), lambda i, j: (i, 0, 0)),
        scratch_shapes=[
            pltpu.VMEM((tn, 1), jnp.float32),             # running row max
            pltpu.VMEM((tn, 1), jnp.float32),             # running exp-sum
        ],
        compiler_params=pltpu.CompilerParams(
            dimension_semantics=("parallel", "arbitrary"),
            vmem_limit_bytes=48 * 1024 * 1024,            # safe on v7x (64 MiB/TC)
        ),
    )(logits2, picked)

    # CrossEntropyLoss(reduction='mean'): divide the global ce sum by N.
    loss_mean = jnp.sum(partials) / N
    # Faithful to the PyTorch forward: the mask only rescales the scalar mean
    # loss (a no-op, NaN when sum(mask) == 0).
    mask_sum = jnp.sum(mask2)
    return (loss_mean * mask_sum) / mask_sum


def _reference(logits, target, mask):
    # Pure-JAX replica of the PyTorch forward for validation.
    B, T, V = logits.shape
    lg = logits.reshape(B * T, V).astype(jnp.float32)
    tg = target[:, 1:].reshape(-1).astype(jnp.int32)
    mk = mask[:, 1:].reshape(-1).astype(jnp.float32)
    logp = jax.nn.log_softmax(lg, axis=-1)
    ce = -jnp.take_along_axis(logp, tg[:, None], axis=-1)[:, 0]
    loss_mean = jnp.mean(ce)                              # reduction='mean'
    return jnp.sum(loss_mean * mk) / jnp.sum(mk)


if __name__ == "__main__":
    # Case 1: small shapes, single vocab block, two row tiles.
    B, T, V = 2, 8, 32
    key = jax.random.PRNGKey(0)
    k1, k2 = jax.random.split(key)
    logits = jax.random.normal(k1, (B, T, V), dtype=jnp.float32)
    target = jax.random.randint(k2, (B, T + 1), 0, V, dtype=jnp.int32)
    lengths = jnp.array([[7], [9]], dtype=jnp.int32)
    mask = (jnp.arange(T + 1)[None, :] < lengths).astype(jnp.float32)

    out = mask_criterion(logits, target, mask)
    jax.block_until_ready(out)
    ref = _reference(logits, target, mask)
    assert jnp.allclose(out, ref, rtol=1e-5, atol=1e-5), (out, ref)

    # Case 2: exercises row tail + vocab tail handling (non-divisible shapes).
    B2, T2, V2 = 3, 7, 200
    k3, k4 = jax.random.split(jax.random.PRNGKey(1))
    logits_b = jax.random.normal(k3, (B2, T2, V2), dtype=jnp.float32)
    target_b = jax.random.randint(k4, (B2, T2 + 1), 0, V2, dtype=jnp.int32)
    lens_b = jnp.array([[5], [8], [3]], dtype=jnp.int32)
    mask_b = (jnp.arange(T2 + 1)[None, :] < lens_b).astype(jnp.float32)

    out_b = mask_criterion(logits_b, target_b, mask_b, tile_n=8, tile_v=128)
    jax.block_until_ready(out_b)
    ref_b = _reference(logits_b, target_b, mask_b)
    assert jnp.allclose(out_b, ref_b, rtol=1e-5, atol=1e-5), (out_b, ref_b)

    print("KERNEL_OK")
</pallas_src>

<mosaic_0001>
module attributes {stable_mosaic.version = 11 : i64} {
  func.func @_mask_ce_kernel(%arg0: i32, %arg1: i32, %arg2: memref<8x32xf32, #tpu.memory_space<vmem>>, %arg3: memref<8x1xf32, #tpu.memory_space<vmem>>, %arg4: memref<1x1x1xf32, #tpu.memory_space<vmem>>, %arg5: memref<8x1xf32, #tpu.memory_space<vmem>>, %arg6: memref<8x1xf32, #tpu.memory_space<vmem>>) attributes {dimension_semantics = [#tpu.dimension_semantics<parallel>, #tpu.dimension_semantics<arbitrary>], iteration_bounds = array<i64: 2, 1>, scalar_prefetch = 0 : i64, scratch_operands = 2 : i64, tpu.core_type = #tpu.core_type<tc>, window_params = [{transform_indices = @transform_0, window_bounds = array<i64: 8, 32>}, {transform_indices = @transform_1, window_bounds = array<i64: 8, 1>}, {transform_indices = @transform_2, window_bounds = array<i64: 1, 1, 1>}]} {
    %c0_i32 = arith.constant 0 : i32
    %0 = arith.cmpi eq, %arg1, %c0_i32 : i32
    %1 = arith.extui %0 : i1 to i32
    %c0_i32_0 = arith.constant 0 : i32
    %2 = arith.cmpi ne, %1, %c0_i32_0 : i32
    scf.if %2 {
      %cst_13 = arith.constant 0xFF800000 : f32
      %23 = vector.broadcast %cst_13 : f32 to vector<8x1xf32>
      %c0_14 = arith.constant 0 : index
      %c0_15 = arith.constant 0 : index
      %24 = vector.load %arg5[%c0_14, %c0_15] : memref<8x1xf32, #tpu.memory_space<vmem>>, vector<8x1xf32>
      tpu.vector_store %arg5[%c0_14, %c0_15], %23 {strides = array<i32>} : memref<8x1xf32, #tpu.memory_space<vmem>>, vector<8x1xf32>,
      %cst_16 = arith.constant 0.000000e+00 : f32
      %25 = vector.broadcast %cst_16 : f32 to vector<8x1xf32>
      %c0_17 = arith.constant 0 : index
      %c0_18 = arith.constant 0 : index
      %26 = vector.load %arg6[%c0_17, %c0_18] : memref<8x1xf32, #tpu.memory_space<vmem>>, vector<8x1xf32>
      tpu.vector_store %arg6[%c0_17, %c0_18], %25 {strides = array<i32>} : memref<8x1xf32, #tpu.memory_space<vmem>>, vector<8x1xf32>,
    } else {
    }
    %c0 = arith.constant 0 : index
    %c0_1 = arith.constant 0 : index
    %3 = vector.load %arg2[%c0, %c0_1] : memref<8x32xf32, #tpu.memory_space<vmem>>, vector<8x32xf32>
    %c0_2 = arith.constant 0 : index
    %c0_3 = arith.constant 0 : index
    %4 = vector.load %arg5[%c0_2, %c0_3] : memref<8x1xf32, #tpu.memory_space<vmem>>, vector<8x1xf32>
    %cst = arith.constant dense<0xFF800000> : vector<8xf32>
    %5 = vector.multi_reduction <maximumf>, %3, %cst [1] : vector<8x32xf32> to vector<8xf32>
    %6 = vector.shape_cast %5 : vector<8xf32> to vector<8x1xf32>
    %7 = arith.maximumf %4, %6 : vector<8x1xf32>
    %c0_4 = arith.constant 0 : index
    %c0_5 = arith.constant 0 : index
    %8 = vector.load %arg6[%c0_4, %c0_5] : memref<8x1xf32, #tpu.memory_space<vmem>>, vector<8x1xf32>
    %9 = arith.subf %4, %7 : vector<8x1xf32>
    %10 = math.exp %9 : vector<8x1xf32>
    %11 = arith.mulf %8, %10 : vector<8x1xf32>
    %12 = vector.broadcast %7 : vector<8x1xf32> to vector<8x32xf32>
    %13 = arith.subf %3, %12 : vector<8x32xf32>
    %14 = math.exp %13 : vector<8x32xf32>
    %cst_6 = arith.constant dense<0.000000e+00> : vector<8xf32>
    %15 = vector.multi_reduction <add>, %14, %cst_6 [1] : vector<8x32xf32> to vector<8xf32>
    %16 = vector.shape_cast %15 : vector<8xf32> to vector<8x1xf32>
    %17 = arith.addf %11, %16 : vector<8x1xf32>
    %c0_7 = arith.constant 0 : index
    %c0_8 = arith.constant 0 : index
    %18 = vector.load %arg6[%c0_7, %c0_8] : memref<8x1xf32, #tpu.memory_space<vmem>>, vector<8x1xf32>
    tpu.vector_store %arg6[%c0_7, %c0_8], %17 {strides = array<i32>} : memref<8x1xf32, #tpu.memory_space<vmem>>, vector<8x1xf32>,
    %c0_9 = arith.constant 0 : index
    %c0_10 = arith.constant 0 : index
    %19 = vector.load %arg5[%c0_9, %c0_10] : memref<8x1xf32, #tpu.memory_space<vmem>>, vector<8x1xf32>
    tpu.vector_store %arg5[%c0_9, %c0_10], %7 {strides = array<i32>} : memref<8x1xf32, #tpu.memory_space<vmem>>, vector<8x1xf32>,
    %c0_i32_11 = arith.constant 0 : i32
    %20 = arith.cmpi eq, %arg1, %c0_i32_11 : i32
    %21 = arith.extui %20 : i1 to i32
    %c0_i32_12 = arith.constant 0 : i32
    %22 = arith.cmpi ne, %21, %c0_i32_12 : i32
    scf.if %22 {
      %c8_i32 = arith.constant 8 : i32
      %23 = arith.muli %arg0, %c8_i32 : i32
      %24 = tpu.iota {dimensions = array<i32: 0>} : vector<8x1xi32>
      %25 = vector.broadcast %23 : i32 to vector<8x1xi32>
      %26 = arith.addi %25, %24 : vector<8x1xi32>
      %c0_13 = arith.constant 0 : index
      %c0_14 = arith.constant 0 : index
      %27 = vector.load %arg5[%c0_13, %c0_14] : memref<8x1xf32, #tpu.memory_space<vmem>>, vector<8x1xf32>
      %c0_15 = arith.constant 0 : index
      %c0_16 = arith.constant 0 : index
      %28 = vector.load %arg6[%c0_15, %c0_16] : memref<8x1xf32, #tpu.memory_space<vmem>>, vector<8x1xf32>
      %29 = math.log %28 : vector<8x1xf32>
      %30 = arith.addf %27, %29 : vector<8x1xf32>
      %c0_17 = arith.constant 0 : index
      %c0_18 = arith.constant 0 : index
      %31 = vector.load %arg3[%c0_17, %c0_18] : memref<8x1xf32, #tpu.memory_space<vmem>>, vector<8x1xf32>
      %32 = arith.subf %30, %31 : vector<8x1xf32>
      %c16_i32 = arith.constant 16 : i32
      %33 = vector.broadcast %c16_i32 : i32 to vector<8x1xi32>
      %34 = arith.cmpi slt, %26, %33 : vector<8x1xi32>
      %cst_19 = arith.constant 0.000000e+00 : f32
      %35 = vector.broadcast %cst_19 : f32 to vector<8x1xf32>
      %36 = arith.select %34, %32, %35 : vector<8x1xi1>, vector<8x1xf32>
      %37 = vector.shape_cast %36 : vector<8x1xf32> to vector<1x8x1xf32>
      %cst_20 = arith.constant dense<0.000000e+00> : vector<1xf32>
      %38 = vector.multi_reduction <add>, %37, %cst_20 [1, 2] : vector<1x8x1xf32> to vector<1xf32>
      %39 = vector.shape_cast %38 : vector<1xf32> to vector<1x1x1xf32>
      %40 = vector.extract %39[0, 0, 0] : f32 from vector<1x1x1xf32>
      %41 = vector.broadcast %40 : f32 to vector<1x1x1xf32>
      %c0_21 = arith.constant 0 : index
      %c0_22 = arith.constant 0 : index
      %c0_23 = arith.constant 0 : index
      %42 = vector.load %arg4[%c0_21, %c0_22, %c0_23] : memref<1x1x1xf32, #tpu.memory_space<vmem>>, vector<1x1x1xf32>
      tpu.vector_store %arg4[%c0_21, %c0_22, %c0_23], %41 {strides = array<i32>} : memref<1x1x1xf32, #tpu.memory_space<vmem>>, vector<1x1x1xf32>,
    } else {
    }
    return
  }
  func.func @transform_0(%arg0: i32, %arg1: i32) -> (i32, i32) {
    %c0_i32 = arith.constant 0 : i32
    return %arg0, %arg1 : i32, i32
  }
  func.func @transform_1(%arg0: i32, %arg1: i32) -> (i32, i32) {
    %c0_i32 = arith.constant 0 : i32
    %c0_i32_0 = arith.constant 0 : i32
    return %arg0, %c0_i32 : i32, i32
  }
  func.func @transform_2(%arg0: i32, %arg1: i32) -> (i32, i32, i32) {
    %c0_i32 = arith.constant 0 : i32
    %c0_i32_0 = arith.constant 0 : i32
    %c0_i32_1 = arith.constant 0 : i32
    return %arg0, %c0_i32, %c0_i32_0 : i32, i32, i32
  }
}

</mosaic_0001>

<bundles_post_ra>
// kernel: tpu_custom_call.1
= control target key start
LH: loop header
LB: loop body
LE: loop exit
PB: predicated region body
PF: predicated region fallthrough
CT: control target
= control target key end

     0   :  { %s399_s9 = smov 0   ;;  %s401_s10 = smov 0   ;;  %s455_s0 = inlined_call_operand.vmem [shape: f32[16,32], index: 0, kind: input, shape index: {}]   ;;  %s456_s1 = inlined_call_operand.vmem [shape: f32[16,1], index: 1, kind: input, shape index: {}]   ;;  %s457_s2 = inlined_call_operand.vmem [shape: f32[2,1,1], index: 2, kind: output, shape index: {}]  }
   0x1   :  { %s403_s11 = smov 0  }
   0x2 LB: > { %s24_s12 = sadd.s32 1, %s375_s10  ;;  %p315_p0 = scmp.ge.s32.totalorder %s379_s11, 1  ;;  %s379_s11 = sphi %s403_s11, %s12_s11   ;;  %s375_s10 = sphi %s401_s10, %s459_s10   ;;  %s371_s9 = sphi %s399_s9, %s458_s9  }
   0x3   : > { %p26_p1 = scmp.ge.s32.totalorder %s24_s12, 2  ;;  %p137_p2 = scmp.lt.s32.totalorder %s379_s11, 3 }
   0x5   : > { %s461_s12 = smov (%p26_p1, %s24_s12), 0  ;;  %p138_p3 = pnand %p315_p0, %p137_p2 }
   0x6   : > { %p163_p4 = scmp.lt.s32.totalorder (!%p138_p3), %s371_s9, 1  ;;  %s318_s18 = sshll.u32 (!%p138_p3), %s371_s9, 3 }
   0x7   : > { %141 = sbr.rel (%p138_p3) target bundleno = 584 (0x248), region = 28 }
   0xc   : > { %vm181_vm0 = vcmask 7168   ;;  %v381_v0 = vmov -inf   ;;  %s422_s13 = scalar_select %p163_p4, %s371_s9, 1  ;;  %vm186_vm1 = vcmask 261120   ;;  %v382_v3 = vmov 0  }
   0xd   : > { %182 = vst.msk [vmem:[#allocation2] sm:$0xff] %vm181_vm0, %v381_v0  ;;  %350 = vset.pattern.permute.xlu0 %v382_v3  ;;  %v383_v4 = vmov 0.0   ;;  %v215_v20 = vlaneseq  ;;  %v217_v23 = vstv %s318_s18  ;;  %vm239_vm3 = vcmask 0  }
   0xe   : > { %s316_s14 = sshll.u32 %s422_s13, 3  ;;  %183 = vst.msk [vmem:[#allocation3] sm:$0xff] %vm181_vm0, %v383_v4  ;;  %s176_s24 = scalar_lea.vmem %s457_s2, %s422_s13 }
   0xf   : > { %s169_s17 = scalar_lea.vmem %s455_s0, %s316_s14  ;;  %v216_v22 = vshrl.u32 %v215_v20, 7  ;;  %s173_s21 = scalar_lea.vmem %s456_s1, %s316_s14 }
  0x10   : > { %v184_v1 = vld [vmem:[%s169_s17] sm:$0xff] }
  0x11   : > { %v187_v2 = vsel %vm186_vm1, %v184_v1, -inf  ;;  %v218_v25 = vadd.s32 %v217_v23, %v216_v22  ;;  %v224_v27 = vld [vmem:[%s173_s21] sm:$0xff] }
  0x12   : > { %188 = vmax.xlane.f32.xlu0 %v187_v2 }
  0x13   : > { %vm226_vm2 = vcmp.lt.s32.totalorder %v218_v25, 16 }
  0x14   : > { %v185_v5 = vld [vmem:[#allocation2] sm:$0xff] }
  0x15   : > { %v191_v16 = vld [vmem:[#allocation3] sm:$0xff] }
  0x85   : > { %v189_v6 = vpop.xlane.xlu0 %188 }
  0x86   : > { %v190_v7 = vmax.f32 %v185_v5, %v189_v6 }
  0x88   : > { %v192_v8 = vsub.f32 %v185_v5, %v190_v7  ;;  %210 = vst.msk [vmem:[#allocation2] sm:$0xff] %vm181_vm0, %v190_v7  ;;  %198 = vperm.xlu0 %350, %v190_v7  }
  0x8a   : > { %v193_v14 = vmul.f32 1.442695, %v192_v8 }
  0x8f   : > { %v219_v28 = vld [vmem:[#allocation2] sm:$0xff] }
  0xfa   : > { %v199_v9 = vpop.permute.xlu0 %198 }
  0xfb   : > { %v201_v10 = vsub.f32 %v184_v1, %v199_v9 }
  0xfd   : > { %v202_v11 = vmul.f32 1.442695, %v201_v10 }
  0xff   : > { %351 = vpow2.f32 %v202_v11 }
 0x100   : > { %353 = vpow2.f32 %v193_v14 }
 0x105   : > { %v352_v12 = vpop.eup %351 }
 0x106   : > { %v204_v13 = vsel %vm186_vm1, %v352_v12, 0.0  ;;  %v354_v15 = vpop.eup %353 }
 0x107   : > { %205 = vadd.xlane.f32.xlu1 %v204_v13  ;;  %v195_v17 = vmul.f32 %v354_v15, %v191_v16 }
 0x17a   : > { %v206_v18 = vpop.xlane.xlu1 %205 }
 0x17b   : > { %v207_v19 = vadd.f32 %v206_v18, %v195_v17 }
 0x17d   : > { %209 = vst.msk [vmem:[#allocation3] sm:$0xff] %vm181_vm0, %v207_v19 }
 0x184   : > { %v220_v21 = vld [vmem:[#allocation3] sm:$0xff] }
 0x185   : > { %355 = vlog2.f32 %v220_v21 }
 0x18b   : > { %v356_v24 = vpop.eup %355 }
 0x18c   : > { %v222_v26 = vmul.f32 0.6931472, %v356_v24 }
 0x18e   : > { %v223_v29 = vadd.f32 %v222_v26, %v219_v28 }
 0x190   : > { %v225_v30 = vsub.f32 %v223_v29, %v224_v27 }
 0x192   : > { %v227_v31 = vsel %vm226_vm2, %v225_v30, 0.0 }
 0x193   : > { %v228_v32 = vsel %vm181_vm0, %v227_v31, 0.0 }
 0x194   : > { %229 = vadd.xlane.f32.xlu1 %v228_v32 }
 0x207   : > { %v230_v33 = vpop.xlane.xlu1 %229 }
 0x208   : > { %v231_v34 = vrot.slane %v230_v33, 4 }
 0x20a   : > { %v232_v35 = vadd.f32 %v231_v34, %v230_v33 }
 0x20c   : > { %v233_v36 = vrot.slane %v232_v35, 2 }
 0x20e   : > { %v234_v37 = vadd.f32 %v233_v36, %v232_v35 }
 0x210   : > { %v235_v38 = vrot.slane %v234_v37, 1 }
 0x212   : > { %v236_v39 = vadd.f32 %v235_v38, %v234_v37 }
 0x214   : > { %321 = vpush %v236_v39 }
 0x245   : > { %s322_s25 = spop %321 }
 0x246   : > { %v238_v40 = vstv %s322_s25 }
 0x247   : > { %240 = vst.msk [vmem:[%s176_s24] sm:$0x1] %vm239_vm3, %v238_v40 }
 0x248 PF: > { %s12_s11 = sadd.s32 1, %s379_s11   ;;  %s458_s9 = smov %s375_s10 }
 0x249   : > { %p9_p5 = scmp.ge.s32.totalorder %s12_s11, 4   ;;  %s459_s10 = smov %s461_s12 }
 0x24b   :  { %11 = sbr.rel (!%p9_p5) target bundleno = 2 (0x2), region = 69 }

</bundles_post_ra>
